<compile_context>
chip_gen: v7x
topology: tpu7x:2x2x1
jax: 0.10.0
libtpu: 0.0.40
codegen_flags: <defaults>
</compile_context>

<pallas_src>
import jax
import jax.numpy as jnp
from jax.experimental import pallas as pl
from jax.experimental.pallas import tpu as pltpu


def gcn_agg_kernel(a_ref, x_ref, w_ref, b_ref, o_ref, h_ref):
    """One grid step: (graph g, A-row-tile r).

    a_ref: (1, tm, n)   row tile of adjacency for graph g
    x_ref: (1, n,  d)   node features for graph g (same block for every r)
    w_ref: (d, d)       torch nn.Linear weight, (out_features, in_features)
    b_ref: (1, d)       bias
    o_ref: (1, tm, d)   output row tile
    h_ref: (n, d) f32   VMEM scratch holding h = x @ W.T + b for the current graph
    """
    # Compute h once per graph (first row tile), cache it in VMEM scratch.
    @pl.when(pl.program_id(1) == 0)
    def _():
        # x @ W.T without an explicit transpose: contract x dim 1 with W dim 1.
        h = jax.lax.dot_general(
            x_ref[0],
            w_ref[...],
            dimension_numbers=(((1,), (1,)), ((), ())),
            preferred_element_type=jnp.float32,
        )
        h_ref[...] = h + b_ref[...]

    # y = A_tile @ h, then leaky_relu (PyTorch default negative_slope = 0.01).
    y = jnp.dot(a_ref[0], h_ref[...], preferred_element_type=jnp.float32)
    o_ref[0] = jnp.where(y > 0.0, y, 0.01 * y).astype(o_ref.dtype)


def gcn_agg(A, x, W, b, *, row_tile=None):
    """GCNAgg forward.

    A: (G, n, n) or (n, n) dense adjacency (stand-in for torch.sparse.mm)
    x: (G, n, d) or (n, d) node features
    W: (d, d) torch nn.Linear weight layout (out_features, in_features)
    b: (d,)   bias
    """
    squeeze = A.ndim == 2
    if squeeze:
        A = A[None]
        x = x[None]
    G, n, _ = A.shape
    d = x.shape[-1]
    assert A.shape == (G, n, n) and x.shape == (G, n, d)
    assert W.shape == (d, d) and b.shape == (d,)

    if row_tile is None:
        # Small graphs: one tile. Larger n: stream A in 256-row slabs (sized so the
        # double-buffered A tile stays far under v7x's 64 MiB VMEM).
        row_tile = n if n <= 512 else 256
    assert n % row_tile == 0 and (row_tile == n or row_tile % 8 == 0)
    num_row_tiles = n // row_tile

    out = pl.pallas_call(
        gcn_agg_kernel,
        out_shape=jax.ShapeDtypeStruct((G, n, d), x.dtype),
        grid_spec=pltpu.PrefetchScalarGridSpec(
            num_scalar_prefetch=0,
            grid=(G, num_row_tiles),
            in_specs=[
                pl.BlockSpec((1, row_tile, n), lambda g, r: (g, r, 0)),  # A row tile
                pl.BlockSpec((1, n, d),       lambda g, r: (g, 0, 0)),   # x (per graph)
                pl.BlockSpec((d, d),          lambda g, r: (0, 0)),      # W (torch layout)
                pl.BlockSpec((1, d),          lambda g, r: (0, 0)),      # bias
            ],
            out_specs=pl.BlockSpec((1, row_tile, d), lambda g, r: (g, r, 0)),
            scratch_shapes=[pltpu.VMEM((n, d), jnp.float32)],            # cached h
        ),
        compiler_params=pltpu.CompilerParams(
            # graphs are independent (megacore-shardable); row tiles of one graph
            # must run in order so the h scratch computed at r==0 is reused.
            dimension_semantics=("parallel", "arbitrary"),
        ),
    )(A, x, W, b.reshape(1, d))

    return out[0] if squeeze else out


def reference(A, x, W, b):
    h = x @ W.T + b
    y = A @ h
    return jnp.where(y > 0.0, y, 0.01 * y)


if __name__ == "__main__":
    key = jax.random.PRNGKey(0)
    k_a, k_x, k_w, k_b = jax.random.split(key, 4)

    # G graphs batched into one pallas_call; hidden_size = 128 keeps the feature /
    # output lane dim fully dense (128 lanes, unmasked stores).
    G, n, d = 4, 64, 128

    # Deterministic synthetic parameters: xavier-normal W (torch layout), small bias.
    xavier_std = (2.0 / (d + d)) ** 0.5
    W = xavier_std * jax.random.normal(k_w, (d, d), dtype=jnp.float32)
    b = 0.1 * jax.random.uniform(k_b, (d,), dtype=jnp.float32, minval=-1.0, maxval=1.0)

    # Inputs: dense 0/1 adjacency per graph + node features.
    A = (jax.random.uniform(k_a, (G, n, n), dtype=jnp.float32) > 0.7).astype(jnp.float32)
    x = jax.random.normal(k_x, (G, n, d), dtype=jnp.float32)

    # Batched path, with row tiling exercised (two A row-tiles per graph).
    out = gcn_agg(A, x, W, b, row_tile=32)
    out = jax.block_until_ready(out)
    ref = jax.vmap(lambda a_, x_: reference(a_, x_, W, b))(A, x)
    assert out.shape == (G, n, d)
    assert jnp.allclose(out, ref, atol=1e-5, rtol=1e-5), "batched mismatch vs reference"

    # Single-graph (2-D) interface, matching the original module signature.
    out1 = jax.block_until_ready(gcn_agg(A[0], x[0], W, b))
    assert out1.shape == (n, d)
    assert jnp.allclose(out1, ref[0], atol=1e-5, rtol=1e-5), "single-graph mismatch"

    print("KERNEL_OK")
</pallas_src>

<mosaic_0001>
module attributes {stable_mosaic.version = 11 : i64} {
  func.func @gcn_agg_kernel(%arg0: i32, %arg1: i32, %arg2: memref<1x32x64xf32, #tpu.memory_space<vmem>>, %arg3: memref<1x64x128xf32, #tpu.memory_space<vmem>>, %arg4: memref<128x128xf32, #tpu.memory_space<vmem>>, %arg5: memref<1x128xf32, #tpu.memory_space<vmem>>, %arg6: memref<1x32x128xf32, #tpu.memory_space<vmem>>, %arg7: memref<64x128xf32, #tpu.memory_space<vmem>>) attributes {dimension_semantics = [#tpu.dimension_semantics<parallel>, #tpu.dimension_semantics<arbitrary>], iteration_bounds = array<i64: 4, 2>, scalar_prefetch = 0 : i64, scratch_operands = 1 : i64, tpu.core_type = #tpu.core_type<tc>, window_params = [{transform_indices = @transform_0, window_bounds = array<i64: 1, 32, 64>}, {transform_indices = @transform_1, window_bounds = array<i64: 1, 64, 128>}, {pipeline_mode = #tpu.pipeline_mode<synchronous>, transform_indices = @transform_2, window_bounds = array<i64: 128, 128>}, {pipeline_mode = #tpu.pipeline_mode<synchronous>, transform_indices = @transform_3, window_bounds = array<i64: 1, 128>}, {transform_indices = @transform_4, window_bounds = array<i64: 1, 32, 128>}]} {
    %c0_i32 = arith.constant 0 : i32
    %0 = arith.cmpi eq, %arg1, %c0_i32 : i32
    %1 = arith.extui %0 : i1 to i32
    %c0_i32_0 = arith.constant 0 : i32
    %2 = arith.cmpi ne, %1, %c0_i32_0 : i32
    scf.if %2 {
      %c0_10 = arith.constant 0 : index
      %c0_11 = arith.constant 0 : index
      %c0_12 = arith.constant 0 : index
      %15 = vector.load %arg3[%c0_10, %c0_11, %c0_12] : memref<1x64x128xf32, #tpu.memory_space<vmem>>, vector<1x64x128xf32>
      %16 = vector.shape_cast %15 : vector<1x64x128xf32> to vector<64x128xf32>
      %c0_13 = arith.constant 0 : index
      %c0_14 = arith.constant 0 : index
      %17 = vector.load %arg4[%c0_13, %c0_14] : memref<128x128xf32, #tpu.memory_space<vmem>>, vector<128x128xf32>
      %cst_15 = arith.constant dense<0.000000e+00> : vector<64x128xf32>
      %18 = tpu.matmul %16, %17, %cst_15 {dimension_numbers = #tpu.dot_dimension_numbers<[1], [1], [0], [0], [0, 0, 1, 0], [], []>} : vector<64x128xf32>, vector<128x128xf32>, vector<64x128xf32> -> vector<64x128xf32>
      %c0_16 = arith.constant 0 : index
      %c0_17 = arith.constant 0 : index
      %19 = vector.load %arg5[%c0_16, %c0_17] : memref<1x128xf32, #tpu.memory_space<vmem>>, vector<1x128xf32>
      %20 = vector.broadcast %19 : vector<1x128xf32> to vector<64x128xf32>
      %21 = arith.addf %18, %20 : vector<64x128xf32>
      %c0_18 = arith.constant 0 : index
      %c0_19 = arith.constant 0 : index
      %22 = vector.load %arg7[%c0_18, %c0_19] : memref<64x128xf32, #tpu.memory_space<vmem>>, vector<64x128xf32>
      tpu.vector_store %arg7[%c0_18, %c0_19], %21 {strides = array<i32>} : memref<64x128xf32, #tpu.memory_space<vmem>>, vector<64x128xf32>,
    } else {
    }
    %c0 = arith.constant 0 : index
    %c0_1 = arith.constant 0 : index
    %c0_2 = arith.constant 0 : index
    %3 = vector.load %arg2[%c0, %c0_1, %c0_2] : memref<1x32x64xf32, #tpu.memory_space<vmem>>, vector<1x32x64xf32>
    %4 = vector.shape_cast %3 : vector<1x32x64xf32> to vector<32x64xf32>
    %c0_3 = arith.constant 0 : index
    %c0_4 = arith.constant 0 : index
    %5 = vector.load %arg7[%c0_3, %c0_4] : memref<64x128xf32, #tpu.memory_space<vmem>>, vector<64x128xf32>
    %cst = arith.constant dense<0.000000e+00> : vector<32x128xf32>
    %6 = tpu.matmul %4, %5, %cst {dimension_numbers = #tpu.dot_dimension_numbers<[1], [0], [0], [1], [0, 0, 1, 1], [], []>} : vector<32x64xf32>, vector<64x128xf32>, vector<32x128xf32> -> vector<32x128xf32>
    %cst_5 = arith.constant 0.000000e+00 : f32
    %7 = vector.broadcast %cst_5 : f32 to vector<32x128xf32>
    %8 = arith.cmpf ogt, %6, %7 : vector<32x128xf32>
    %cst_6 = arith.constant 0.00999999977 : f32
    %9 = vector.broadcast %cst_6 : f32 to vector<32x128xf32>
    %10 = arith.mulf %9, %6 : vector<32x128xf32>
    %11 = arith.select %8, %6, %10 : vector<32x128xi1>, vector<32x128xf32>
    %c0_7 = arith.constant 0 : index
    %c0_8 = arith.constant 0 : index
    %c0_9 = arith.constant 0 : index
    %12 = vector.load %arg6[%c0_7, %c0_8, %c0_9] : memref<1x32x128xf32, #tpu.memory_space<vmem>>, vector<1x32x128xf32>
    %13 = vector.shape_cast %12 : vector<1x32x128xf32> to vector<32x128xf32>
    %14 = vector.shape_cast %11 : vector<32x128xf32> to vector<1x32x128xf32>
    tpu.vector_store %arg6[%c0_7, %c0_8, %c0_9], %14 {strides = array<i32>} : memref<1x32x128xf32, #tpu.memory_space<vmem>>, vector<1x32x128xf32>,
    return
  }
  func.func @transform_0(%arg0: i32, %arg1: i32) -> (i32, i32, i32) {
    %c0_i32 = arith.constant 0 : i32
    %c0_i32_0 = arith.constant 0 : i32
    return %arg0, %arg1, %c0_i32 : i32, i32, i32
  }
  func.func @transform_1(%arg0: i32, %arg1: i32) -> (i32, i32, i32) {
    %c0_i32 = arith.constant 0 : i32
    %c0_i32_0 = arith.constant 0 : i32
    %c0_i32_1 = arith.constant 0 : i32
    return %arg0, %c0_i32, %c0_i32_0 : i32, i32, i32
  }
  func.func @transform_2(%arg0: i32, %arg1: i32) -> (i32, i32) {
    %c0_i32 = arith.constant 0 : i32
    %c0_i32_0 = arith.constant 0 : i32
    %c0_i32_1 = arith.constant 0 : i32
    return %c0_i32, %c0_i32_0 : i32, i32
  }
  func.func @transform_3(%arg0: i32, %arg1: i32) -> (i32, i32) {
    %c0_i32 = arith.constant 0 : i32
    %c0_i32_0 = arith.constant 0 : i32
    %c0_i32_1 = arith.constant 0 : i32
    return %c0_i32, %c0_i32_0 : i32, i32
  }
  func.func @transform_4(%arg0: i32, %arg1: i32) -> (i32, i32, i32) {
    %c0_i32 = arith.constant 0 : i32
    %c0_i32_0 = arith.constant 0 : i32
    return %arg0, %arg1, %c0_i32 : i32, i32, i32
  }
}

</mosaic_0001>

<bundles_post_ra>
// kernel: tpu_custom_call.1
= control target key start
LH: loop header
LB: loop body
LE: loop exit
PB: predicated region body
PF: predicated region fallthrough
CT: control target
= control target key end

     0   :  { %s1657_s0 = inlined_call_operand.hbm [shape: f32[4,64,64], index: 0, kind: input, shape index: {}]   ;;  %s1658_s1 = inlined_call_operand.hbm [shape: f32[4,64,128], index: 1, kind: input, shape index: {}]   ;;  %s1659_s2 = inlined_call_operand.hbm [shape: f32[128,128], index: 2, kind: input, shape index: {}]   ;;  %s1660_s3 = inlined_call_operand.vmem [shape: f32[1,128], index: 3, kind: input, shape index: {}]   ;;  %s1661_s4 = inlined_call_operand.hbm [shape: f32[4,64,128], index: 4, kind: output, shape index: {}]  }
   0x1   :  { %1679 = sst [smem:[#allocation20_spill]] %s1659_s2 }
   0x2   :  { %1680 = sst [smem:[#allocation21_spill]] %s1660_s3 }
   0x3   :  { %1681 = sst [smem:[#allocation22_spill]] %s1661_s4 }
   0x4   :  { %9 = vsyncpa [#allocation4], 0 }
   0x5   :  { %11 = vsyncpa [#allocation4 + $0x1], 0 }
   0x6   :  { %12 = vsyncpa [#allocation7], 0 }
   0x7   :  { %14 = vsyncpa [#allocation7 + $0x1], 0 }
   0x8   :  { %15 = vsyncpa [#allocation5], 0 }
   0x9   :  { %17 = vsyncpa [#allocation5 + $0x1], 0  ;;  %s1281_s15 = smov 0   ;;  %s1283_s16 = smov 0  }
   0xa   :  { %s1285_s17 = smov 0   ;;  %s1287_s18 = smov 0  }
   0xb   :  { %s1289_s19 = smov 0   ;;  %s1291_s20 = smov 0  }
   0xc   :  { %s1293_s21 = smov 0   ;;  %s1295_s22 = smov 0  }
   0xd   :  { %s1297_s23 = smov 0   ;;  %s1299_s24 = smov 0  }
   0xe   :  { %s1301_s25 = smov 0  }
   0xf LB: > { %1682 = sst [smem:[#allocation14_spill]] %s1218_s18  ;;  %s1335_s26 = sadd.s32 4294967295, %s1246_s25   ;;  %s1246_s25 = sphi %s1301_s25, %s23_s25   ;;  %s1242_s24 = sphi %s1299_s24, %s1728_s24   ;;  %s1238_s23 = sphi %s1297_s23, %s1727_s23   ;;  %s1234_s22 = sphi %s1295_s22, %s1726_s22   ;;  %s1230_s21 = sphi %s1293_s21, %s1725_s21   ;;  %s1226_s20 = sphi %s1291_s20, %s1724_s20   ;;  %s1222_s19 = sphi %s1289_s19, %s1723_s19   ;;  %s1218_s18 = sphi %s1287_s18, %s1722_s18   ;;  %s1214_s17 = sphi %s1285_s17, %s1721_s17   ;;  %s1210_s16 = sphi %s1283_s16, %s1720_s16   ;;  %s1206_s15 = sphi %s1281_s15, %s1719_s15  }
  0x10   : > { %1683 = sst [smem:[#allocation15_spill]] %s1234_s22  ;;  %s703_s27 = sadd.s32 4294967294, %s1246_s25  }
  0x11   : > { %p57_p0 = scmp.ne.s32.totalorder %s1222_s19, %s1218_s18  ;;  %p1662_p1 = scmp.eq.s32.totalorder %s1335_s26, 0 }
  0x12   : > { %p83_p2 = scmp.ne.s32.totalorder %s1210_s16, %s1206_s15  ;;  %p157_p5 = scmp.eq.s32.totalorder %s703_s27, 7 }
  0x13   : > { %p1345_p4 = por %p1662_p1, %p57_p0  ;;  %p704_p7 = scmp.ge.s32.totalorder %s1246_s25, 1 }
  0x14   : > { %p1351_p6 = por %p83_p2, %p1662_p1  ;;  %p1356_p8 = por %p157_p5, %p57_p0 }
  0x15   : > { %s1684_s28 = scalar_select %p1345_p4, 1, 0 }
  0x16   : > { %s1685_s29 = scalar_select %p1351_p6, 1, 0 }
  0x17   : > { %s1686_s30 = scalar_select %p1356_p8, 1, 0 }
  0x18   : > { %p164_p9 = scmp.lt.s32.totalorder %s1246_s25, 9  ;;  %s1248_s6 = smov [#allocation8]  }
  0x19   : > { %1687 = sst [smem:[#allocation16_spill]] %s1686_s30  ;;  %s176_s7 = sshll.u32 %s1248_s6, 4  ;;  %s177_s7 = int_to_ptr.vmem [resolvable:$true] %s176_s7 }
  0x1a   : > { %p1361_p10 = pnand %p704_p7, %p164_p9  ;;  %s1690_s2 = sld [smem:[#allocation20_spill]] }
  0x1c   : > { %s1688_s5 = scalar_select %p1361_p10, 1, 0 }
  0x1d   : > { %p916_p11 = pneg %p1361_p10 }
  0x1f   : > { %p1369_p12 = pnand %p916_p11, %p1662_p1 }
  0x20   : > { %s1028_s11 = scalar_lea.hbm %s1690_s2, 2048 }
  0x21   : > { %p1029_p13 = scmp.ne.s32.totalorder %s1690_s2, %s1028_s11  ;;  %p1030_p0 = pneg %p1369_p12 }
  0x22   : > { %p1035_p7 = scmp.lt.u32.totalorder %s1028_s11, %s1690_s2 }
  0x23   : > { %p1031_p2 = pnand %p1030_p0, %p1029_p13 }
  0x25   : > { %p1032_p5 = pneg %p1031_p2 }
  0x27   : > { %p1037_p9 = pnand %p1035_p7, %p1032_p5 }
  0x29   : > { %1040 = shalt.err (!%p1037_p9)
}
  0x2a   : > { %s1041_s27 = scalar_lea.vmem %s177_s7, 2048  ;;  %p1049_p8 = scmp.lt.s32.totalorder %s177_s7, %s177_s7 }
  0x2b   : > { %p1042_p11 = scmp.ne.s32.totalorder %s177_s7, %s1041_s27  ;;  %p1050_p6 = scmp.lt.s32.totalorder %s1041_s27, %s1041_s27 }
  0x2d   : > { %p1044_p1 = pnand %p1042_p11, %p1030_p0  ;;  %p1051_p4 = por %p1050_p6, %p1049_p8 }
  0x2f   : > { %p1045_p3 = pneg %p1044_p1 }
  0x31   : > { %p1052_p10 = pnand %p1051_p4, %p1045_p3 }
  0x33   : > { %1055 = shalt.err (!%p1052_p10)
}
  0x34   : > { %s1666_s6 = smov 128   ;;  %s1668_s9 = smov 8  }
  0x35   : > { %919 = dma.hbm_to_vmem [thread:$0]  (!%p1369_p12), %s1690_s2, 2048, %s177_s7, [#allocation7], %s1666_s6, %s1666_s6, %s1668_s9  }
  0x36   : > { %s32_s12 = sadd.s32 1, %s1238_s23  ;;  %s35_s13 = sadd.s32 1, %s1242_s24 }
  0x37   : > { %p33_p1 = scmp.ge.s32.totalorder %s32_s12, 2  ;;  %s44_s14 = sadd.s32 1, %s1226_s20 }
  0x38   : > { %p51_p3 = scmp.ne.s32.totalorder %s1226_s20, %s1222_s19  ;;  %p1678_p4 = scmp.eq.s32.totalorder %s1246_s25, 0 }
  0x39   : > { %s1730_s12 = smov (%p33_p1, %s32_s12), 0  ;;  %s1732_s13 = smov (!%p33_p1, %s35_s13), %s1242_s24 }
  0x3a   : > { %1691 = sst [smem:[#allocation17_spill]] %s1730_s12  ;;  %s40_s8 = ssub.s32 %s1238_s23, %s1730_s12 }
  0x3b   : > { %p37_p6 = scmp.ge.s32.totalorder %s1732_s13, 4  ;;  %p1692_p8 = scmp.eq.s32.totalorder %s1335_s26, 7 }
  0x3c   : > { %p1411_p12 = por %p1678_p4, %p51_p3  ;;  %p1677_p13 = scmp.lt.s32.totalorder %s1246_s25, 8 }
  0x3d   : > { %p1405_p10 = por %p1692_p8, %p51_p3  ;;  %s1734_s13 = smov (%p37_p6, %s1732_s13), 0 }
  0x3e   : > { %1696 = sst [smem:[#allocation19_spill]] %s1734_s13  ;;  %s193_s27 = sand.u32 1, %s1226_s20  }
  0x3f   : > { %s1693_s15 = scalar_select %p1405_p10, 1, 0 }
  0x40   : > { %s708_s10 = sshll.u32 %s1238_s23, 2  ;;  %s1422_s11 = ssub.s32 %s1242_s24, %s1734_s13 }
  0x41   : > { %1694 = sst [smem:[#allocation18_spill]] %s1693_s15  ;;  %s41_s6 = sor.u32 %s40_s8, %s1422_s11 }
  0x42   : > { %p42_p2 = scmp.eq.s32.totalorder %s41_s6, 0  ;;  %s707_s9 = sshll.u32 %s193_s27, 5 }
  0x43   : > { %s709_s2 = sshll.u32 %s1242_s24, 3  ;;  %s197_s18 = scalar_lea.vmem [#allocation3], %s707_s9 }
  0x44   : > { %s1428_s12 = scalar_select %p42_p2, %s1226_s20, %s44_s14  }
  0x45   : > { %s203_s30 = sadd.s32 %s709_s2, %s708_s10  ;;  %s206_s4 = sshll.u32 %s197_s18, 4  ;;  %s1430_s4 = int_to_ptr.vmem [resolvable:$true] %s206_s4 }
  0x46   : > { %s710_s15 = sshll.u32 %s203_s30, 7  ;;  %p1441_p5 = pnand %p1677_p13, %p1411_p12 }
  0x47   : > { %s1435_s13 = scalar_lea.hbm %s1657_s0, %s710_s15  ;;  %s216_s2 = sand.u32 1, %s1246_s25  }
  0x48   : > { %s1446_s18 = scalar_lea.sflag [#allocation4], %s193_s27  ;;  %s1056_s30 = scalar_lea.hbm %s1435_s13, 512 }
  0x49   : > { %p1057_p7 = scmp.ne.s32.totalorder %s1435_s13, %s1056_s30  ;;  %p1058_p9 = pneg %p1441_p5 }
  0x4a   : > { %s1061_s9 = scalar_lea.hbm %s1657_s0, 4096  ;;  %p1062_p3 = scmp.lt.u32.totalorder %s1435_s13, %s1657_s0 }
  0x4b   : > { %p1059_p11 = pnand %p1058_p9, %p1057_p7  ;;  %p1063_p6 = scmp.lt.u32.totalorder %s1061_s9, %s1056_s30 }
  0x4c   : > { %p1065_p12 = scmp.lt.u32.totalorder %s1056_s30, %s1435_s13 }
  0x4d   : > { %p1060_p1 = pneg %p1059_p11  ;;  %p1064_p8 = por %p1063_p6, %p1062_p3 }
  0x4f   : > { %p1066_p2 = por %p1065_p12, %p1064_p8 }
  0x51   : > { %p1067_p13 = pnand %p1066_p2, %p1060_p1 }
  0x53   : > { %1070 = shalt.err (!%p1067_p13)
}
  0x54   : > { %s1071_s15 = scalar_lea.vmem %s1430_s4, 512  ;;  %s1251_s7 = smov [#allocation3]  }
  0x55   : > { %p1072_p7 = scmp.ne.s32.totalorder %s1430_s4, %s1071_s15  ;;  %s1076_s27 = sshll.u32 %s1251_s7, 4  ;;  %s1077_s27 = int_to_ptr.vmem [resolvable:$false] %s1076_s27 }
  0x56   : > { %s1078_s10 = scalar_lea.vmem %s1077_s27, 1024  ;;  %p1079_p0 = scmp.lt.s32.totalorder %s1430_s4, %s1077_s27 }
  0x57   : > { %p1074_p11 = pnand %p1072_p7, %p1058_p9  ;;  %p1080_p3 = scmp.lt.s32.totalorder %s1078_s10, %s1071_s15 }
  0x59   : > { %p1075_p4 = pneg %p1074_p11  ;;  %p1081_p6 = por %p1080_p3, %p1079_p0 }
  0x5b   : > { %p1082_p8 = pnand %p1081_p6, %p1075_p4 }
  0x5d   : > { %1085 = shalt.err (!%p1082_p8)
}
  0x5e   : > { %s1698_s30 = smov 8   ;;  %s1699_s3 = smov 128  }
  0x5f   : > { %923 = dma.hbm_to_vmem [thread:$0]  (!%p1441_p5), %s1435_s13, 512, %s1430_s4, %s1446_s18, %s1699_s3, %s1699_s3, %s1698_s30  }
  0x60   : > { %s70_s22 = sadd.s32 1, %s1214_s17  ;;  %p77_p4 = scmp.ne.s32.totalorder %s1214_s17, %s1210_s16 }
  0x61   : > { %p1700_p13 = scmp.eq.s32.totalorder %s1422_s11, 0  ;;  %p1701_p0 = scmp.eq.s32.totalorder %s1246_s25, 0 }
  0x62   : > { %s218_s9 = sand.u32 1, %s1214_s17   ;;  %s731_s14 = sshll.u32 %s1242_s24, 10 }
  0x63   : > { %s1483_s6 = scalar_select %p1700_p13, %s1214_s17, %s70_s22  }
  0x64   : > { %p79_p9 = por %p77_p4, %p1701_p0  ;;  %s711_s8 = sshll.u32 %s218_s9, 6 }
  0x65   : > { %s1492_s27 = scalar_lea.hbm %s1658_s1, %s731_s14  ;;  %p1702_p1 = scmp.lt.s32.totalorder %s1246_s25, 8 }
  0x66   : > { %s220_s13 = scalar_lea.vmem [#allocation6], %s711_s8  ;;  %s1504_s18 = scalar_lea.sflag [#allocation7], %s216_s2 }
  0x67   : > { %p1496_p5 = pnand %p1702_p1, %p79_p9  ;;  %s227_s11 = sshll.u32 %s220_s13, 4  ;;  %s1500_s11 = int_to_ptr.vmem [resolvable:$true] %s227_s11 }
  0x68   : > { %s1086_s10 = scalar_lea.hbm %s1492_s27, 1024  ;;  %s1091_s14 = scalar_lea.hbm %s1658_s1, 4096 }
  0x69   : > { %p1087_p12 = scmp.ne.s32.totalorder %s1492_s27, %s1086_s10  ;;  %p1088_p2 = pneg %p1496_p5 }
  0x6a   : > { %p1092_p3 = scmp.lt.u32.totalorder %s1492_s27, %s1658_s1  ;;  %p1093_p6 = scmp.lt.u32.totalorder %s1091_s14, %s1086_s10 }
  0x6b   : > { %p1089_p7 = pnand %p1088_p2, %p1087_p12  ;;  %p1095_p4 = scmp.lt.u32.totalorder %s1086_s10, %s1492_s27 }
  0x6c   : > { %p1094_p8 = por %p1093_p6, %p1092_p3 }
  0x6d   : > { %p1090_p11 = pneg %p1089_p7 }
  0x6e   : > { %p1096_p13 = por %p1095_p4, %p1094_p8 }
  0x70   : > { %p1097_p0 = pnand %p1096_p13, %p1090_p11 }
  0x72   : > { %1100 = shalt.err (!%p1097_p0)
}
  0x73   : > { %s1101_s2 = scalar_lea.vmem %s1500_s11, 1024  ;;  %s1252_s7 = smov [#allocation6]  }
  0x74   : > { %p1102_p9 = scmp.ne.s32.totalorder %s1500_s11, %s1101_s2  ;;  %s1106_s13 = sshll.u32 %s1252_s7, 4  ;;  %s1107_s13 = int_to_ptr.vmem [resolvable:$false] %s1106_s13 }
  0x75   : > { %s1108_s22 = scalar_lea.vmem %s1107_s13, 2048  ;;  %p1109_p7 = scmp.lt.s32.totalorder %s1500_s11, %s1107_s13 }
  0x76   : > { %p1104_p1 = pnand %p1102_p9, %p1088_p2  ;;  %p1110_p3 = scmp.lt.s32.totalorder %s1108_s22, %s1101_s2 }
  0x78   : > { %p1105_p12 = pneg %p1104_p1  ;;  %p1111_p6 = por %p1110_p3, %p1109_p7 }
  0x7a   : > { %p1112_p8 = pnand %p1111_p6, %p1105_p12 }
  0x7c   : > { %1115 = shalt.err (!%p1112_p8)
}
  0x7d   : > { %926 = dma.hbm_to_vmem [thread:$0]  (!%p1496_p5), %s1492_s27, 1024, %s1500_s11, %s1504_s18, %s1699_s3, %s1699_s3, %s1698_s30  }
  0x7e   : > { %p1704_p2 = scmp.ne.s32.totalorder %s1688_s5, 0 }
  0x7f   : > { %s1538_s10 = sand.u32 (!%p1704_p2), 1, %s1222_s19   ;;  %p1705_p11 = scmp.ne.s32.totalorder (!%p1704_p2), %s1684_s28, 0 }
  0x80   : > { %239 = sbr.rel (%p1704_p2) target bundleno = 686 (0x2ae), region = 36  ;;  %s715_s9 = sshll.u32 (!%p1704_p2), %s1538_s10, 5 }
  0x81   : > { %s242_s14 = scalar_lea.sflag (!%p1704_p2), [#allocation4], %s1538_s10  ;;  %s1542_s15 = scalar_lea.vmem (!%p1704_p2), [#allocation3], %s715_s9 }
  0x87   : > { %1189 = dma.done.wait (%p1705_p11), %s242_s14, 512  }
  0x88   : > { %1191 = vsyncadd (%p1705_p11), %s242_s14, 4294966784  ;;  %s250_s5 = sand.u32 1, %s1335_s26   ;;  %s252_s30 = sand.u32 1, %s1210_s16  }
  0x89   : > { %s716_s3 = sshll.u32 %s252_s30, 6  ;;  %s251_s27 = scalar_lea.sflag [#allocation7], %s250_s5 }
  0x8a   : > { %s1550_s4 = scalar_lea.vmem [#allocation6], %s716_s3  ;;  %p1706_p5 = scmp.ne.s32.totalorder %s1685_s29, 0 }
  0x8c   : > { %1193 = dma.done.wait (%p1706_p5), %s251_s27, 1024  }
  0x8d   : > { %1195 = vsyncadd (%p1706_p5), %s251_s27, 4294966272  ;;  %p1707_p4 = scmp.eq.s32.totalorder %s1335_s26, 0 }
  0x8f   : > { %1197 = dma.done.wait (%p1707_p4), [#allocation7], 2048   ;;  %p1708_p13 = pmov %p1707_p4 }
  0x90   : > { %s1560_s28 = scalar_lea.vmem [#allocation9], %s715_s9  ;;  %p719_p0 = scmp.ne.s32.totalorder %s1230_s21, 0 }
  0x91   : > { %1199 = vsyncadd (%p1708_p13), [#allocation7], 4294965248  ;;  %v302_v0 = vld [vmem:[#allocation8] sm:$0xff] (!%p719_p0)  ;;  %v303_v1 = vld [vmem:[#allocation8 + $0x8] sm:$0xff] (!%p719_p0)  ;;  %s1709_s11 = sld [smem:[#allocation21_spill]] (!%p719_p0) }
  0x92   : > { %293 = sbr.rel (%p719_p0) target bundleno = 432 (0x1b0), region = 52  ;;  %v304_v2 = vld [vmem:[#allocation8 + $0x10] sm:$0xff] (!%p719_p0)  ;;  %v834_v3 = vpack.c.bf16 (!%p719_p0), %v303_v1, %v302_v0  ;;  %v305_v4 = vld [vmem:[#allocation8 + $0x18] sm:$0xff] (!%p719_p0)  ;;  %v294_v6 = vld [vmem:[%s1550_s4] sm:$0xff] (!%p719_p0) }
  0x93   : > { %v838_v5 = vpack.c.bf16 (!%p719_p0), %v305_v4, %v304_v2  ;;  %v298_v7 = vld [vmem:[%s1550_s4 + $0x20] sm:$0xff] (!%p719_p0)  ;;  %v307_v9 = vld [vmem:[#allocation8 + $0x28] sm:$0xff] (!%p719_p0)  ;;  %800 = vmatprep.mubr.f32.mxu0 (!%p719_p0), %v294_v6  ;;  %v308_v11 = vld [vmem:[#allocation8 + $0x30] sm:$0xff] (!%p719_p0) }
  0x94   : > { %835 = vmatprep.subr.bf16.mxu0 (!%p719_p0), %v834_v3  ;;  %882 = vmatprep.subr.bf16.mxu1 (!%p719_p0), %v834_v3  ;;  %v306_v8 = vld [vmem:[#allocation8 + $0x20] sm:$0xff] (!%p719_p0)  ;;  %v309_v12 = vld [vmem:[#allocation8 + $0x38] sm:$0xff] (!%p719_p0)  ;;  %v311_v15 = vld [vmem:[#allocation8 + $0x48] sm:$0xff] (!%p719_p0) }
  0x95   : > { %837 = vmatpush3.bf16.xpose.msra.mxu0 (!%p719_p0), %v834_v3  ;;  %890 = vmatpush3.bf16.xpose.msra.mxu1 (!%p719_p0), %v834_v3  ;;  %v842_v10 = vpack.c.bf16 (!%p719_p0), %v307_v9, %v306_v8  ;;  %v846_v13 = vpack.c.bf16 (!%p719_p0), %v309_v12, %v308_v11  ;;  %v310_v14 = vld [vmem:[#allocation8 + $0x40] sm:$0xff] (!%p719_p0)  ;;  %v312_v17 = vld [vmem:[#allocation8 + $0x50] sm:$0xff] (!%p719_p0)  ;;  %v313_v18 = vld [vmem:[#allocation8 + $0x58] sm:$0xff] (!%p719_p0) }
  0x96   : > { %839 = vmatprep.subr.bf16.mxu0 (!%p719_p0), %v838_v5  ;;  %883 = vmatprep.subr.bf16.mxu1 (!%p719_p0), %v838_v5  ;;  %v850_v16 = vpack.c.bf16 (!%p719_p0), %v311_v15, %v310_v14  ;;  %v854_v19 = vpack.c.bf16 (!%p719_p0), %v313_v18, %v312_v17  ;;  %v314_v20 = vld [vmem:[#allocation8 + $0x60] sm:$0xff] (!%p719_p0)  ;;  %v315_v21 = vld [vmem:[#allocation8 + $0x68] sm:$0xff] (!%p719_p0)  ;;  %v316_v23 = vld [vmem:[#allocation8 + $0x70] sm:$0xff] (!%p719_p0) }
  0x97   : > { %806 = vmatprep.mubr.f32.mxu1 (!%p719_p0), %v298_v7  ;;  %v858_v22 = vpack.c.bf16 (!%p719_p0), %v315_v21, %v314_v20  ;;  %v317_v24 = vld [vmem:[#allocation8 + $0x78] sm:$0xff] (!%p719_p0)  ;;  %v295_v26 = vld [vmem:[%s1550_s4 + $0x8] sm:$0xff] (!%p719_p0)  ;;  %v296_v28 = vld [vmem:[%s1550_s4 + $0x10] sm:$0xff] (!%p719_p0) }
  0x98   : > { %v862_v25 = vpack.c.bf16 (!%p719_p0), %v317_v24, %v316_v23  ;;  %v299_v27 = vld [vmem:[%s1550_s4 + $0x28] sm:$0xff] (!%p719_p0)  ;;  %v300_v29 = vld [vmem:[%s1550_s4 + $0x30] sm:$0xff] (!%p719_p0)  ;;  %v297_v30 = vld [vmem:[%s1550_s4 + $0x18] sm:$0xff] (!%p719_p0) }
  0x99   : > { %v301_v31 = vld [vmem:[%s1550_s4 + $0x38] sm:$0xff]  ;;  %v720_v32 = vld [vmem:[%s1709_s11] ss:$0 sm:$0xff] }
  0x9d   : > { %841 = vmatpush3.bf16.xpose.msra.mxu0 %v838_v5  ;;  %891 = vmatpush3.bf16.xpose.msra.mxu1 %v838_v5 }
  0x9e   : > { %843 = vmatprep.subr.bf16.mxu0 %v842_v10  ;;  %884 = vmatprep.subr.bf16.mxu1 %v842_v10 }
  0xa5   : > { %845 = vmatpush3.bf16.xpose.msra.mxu0 %v842_v10  ;;  %892 = vmatpush3.bf16.xpose.msra.mxu1 %v842_v10 }
  0xa6   : > { %847 = vmatprep.subr.bf16.mxu0 %v846_v13  ;;  %885 = vmatprep.subr.bf16.mxu1 %v846_v13 }
  0xad   : > { %849 = vmatpush3.bf16.xpose.msra.mxu0 %v846_v13  ;;  %893 = vmatpush3.bf16.xpose.msra.mxu1 %v846_v13 }
  0xae   : > { %851 = vmatprep.subr.bf16.mxu0 %v850_v16  ;;  %886 = vmatprep.subr.bf16.mxu1 %v850_v16 }
  0xb5   : > { %853 = vmatpush3.bf16.xpose.msra.mxu0 %v850_v16  ;;  %894 = vmatpush3.bf16.xpose.msra.mxu1 %v850_v16 }
  0xb6   : > { %855 = vmatprep.subr.bf16.mxu0 %v854_v19  ;;  %887 = vmatprep.subr.bf16.mxu1 %v854_v19 }
  0xbd   : > { %857 = vmatpush3.bf16.xpose.msra.mxu0 %v854_v19  ;;  %895 = vmatpush3.bf16.xpose.msra.mxu1 %v854_v19 }
  0xbe   : > { %859 = vmatprep.subr.bf16.mxu0 %v858_v22  ;;  %888 = vmatprep.subr.bf16.mxu1 %v858_v22 }
  0xc5   : > { %861 = vmatpush3.bf16.xpose.msra.mxu0 %v858_v22  ;;  %896 = vmatpush3.bf16.xpose.msra.mxu1 %v858_v22 }
  0xc6   : > { %863 = vmatprep.subr.bf16.mxu0 %v862_v25  ;;  %889 = vmatprep.subr.bf16.mxu1 %v862_v25 }
  0xcd   : > { %865 = vmatpush3.bf16.xpose.msra.mxu0 %v862_v25  ;;  %897 = vmatpush3.bf16.xpose.msra.mxu1 %v862_v25 }
  0xd4   : > { %801 = vmatmul.mubr.f32.vlgmr.msra.gmra.mrb[0].mxu0 %v295_v26  ;;  %807 = vmatmul.mubr.f32.vlgmr.msra.gmra.mrb[0].mxu1 %v299_v27 }
  0xd5   : > { %803 = vmatprep.mubr.f32.mxu0 %v296_v28  ;;  %809 = vmatprep.mubr.f32.mxu1 %v300_v29 }
  0xd8   : > { %804 = vmatmul.mubr.f32.gmra.mrb[2].mxu0 %v297_v30  ;;  %810 = vmatmul.mubr.f32.gmra.mrb[2].mxu1 %v301_v31 }
 0x1a7   : > { %v802_v33 = vpop.f32.mrb[0].mxu0  ;;  %v808_v34 = vpop.f32.mrb[0].mxu1 }
 0x1a8   : > { %v397_v35 = vadd.f32 %v802_v33, %v720_v32  ;;  %v417_v36 = vadd.f32 %v808_v34, %v720_v32  ;;  %v391_v37 = vpop.f32.mrb[1].mxu0  ;;  %v411_v38 = vpop.f32.mrb[1].mxu1 }
 0x1a9   : > { %v392_v39 = vadd.f32 %v720_v32, %v391_v37  ;;  %v412_v40 = vadd.f32 %v720_v32, %v411_v38 }
 0x1aa   : > { %431 = vst [vmem:[#allocation2 + $0x8] sm:$0xff] %v397_v35  ;;  %435 = vst [vmem:[#allocation2 + $0x28] sm:$0xff] %v417_v36 }
 0x1ab   : > { %430 = vst [vmem:[#allocation2] sm:$0xff] %v392_v39  ;;  %434 = vst [vmem:[#allocation2 + $0x20] sm:$0xff] %v412_v40  ;;  %v805_v41 = vpop.f32.mrb[2].mxu0  ;;  %v811_v42 = vpop.f32.mrb[2].mxu1 }
 0x1ac   : > { %v407_v43 = vadd.f32 %v805_v41, %v720_v32  ;;  %v427_v44 = vadd.f32 %v811_v42, %v720_v32  ;;  %v401_v45 = vpop.f32.mrb[3].mxu0  ;;  %v421_v46 = vpop.f32.mrb[3].mxu1 }
 0x1ad   : > { %v402_v47 = vadd.f32 %v720_v32, %v401_v45  ;;  %v422_v48 = vadd.f32 %v720_v32, %v421_v46 }
 0x1ae   : > { %433 = vst [vmem:[#allocation2 + $0x18] sm:$0xff] %v407_v43  ;;  %437 = vst [vmem:[#allocation2 + $0x38] sm:$0xff] %v427_v44 }
 0x1af   : > { %432 = vst [vmem:[#allocation2 + $0x10] sm:$0xff] %v402_v47  ;;  %436 = vst [vmem:[#allocation2 + $0x30] sm:$0xff] %v422_v48 }
 0x1b0 PF: > { %v438_v57 = vld [vmem:[%s1542_s15] sm:$0xff]  ;;  %vm450_vm0 = vcmask 523264   ;;  %v440_v58 = vld [vmem:[%s1542_s15 + $0x10] sm:$0xff]  ;;  %s1710_s18 = sld [smem:[#allocation15_spill]]  ;;  %v439_v63 = vld [vmem:[%s1542_s15 + $0x8] sm:$0xff]  ;;  %s726_s8 = sshll.u32 %s1230_s21, 2 }
 0x1b1   : > { %v443_v50 = vld [vmem:[#allocation2 + $0x8] sm:$0xff]  ;;  %828 = vmatprep.mubr.msk.f32.mxu0 %vm450_vm0, %v438_v57  ;;  %831 = vmatprep.mubr.msk.f32.mxu1 %vm450_vm0, %v440_v58  ;;  %v441_v0 = vld [vmem:[%s1542_s15 + $0x18] sm:$0xff]  ;;  %s580_s22 = sshll.u32 %s1560_s28, 4  ;;  %s1712_s15 = sld [smem:[#allocation22_spill]]  ;;  %s1592_s22 = int_to_ptr.vmem [resolvable:$true] %s580_s22 }
 0x1b2   : > { %v442_v49 = vld [vmem:[#allocation2] sm:$0xff]  ;;  %v447_v56 = vld [vmem:[#allocation2 + $0x28] sm:$0xff]  ;;  %s565_s3 = scalar_lea.sflag [#allocation5], %s1538_s10  ;;  %s1116_s27 = scalar_lea.vmem %s1592_s22, 512 }
 0x1b3   : > { %v866_v52 = vpack.c.bf16 %v443_v50, %v442_v49  ;;  %v446_v55 = vld [vmem:[#allocation2 + $0x20] sm:$0xff]  ;;  %p1117_p9 = scmp.ne.s32.totalorder %s1592_s22, %s1116_s27  ;;  %s1253_s4 = smov [#allocation9]  }
 0x1b4   : > { %v874_v59 = vpack.c.bf16 %v447_v56, %v446_v55  ;;  %s1120_s26 = sshll.u32 %s1253_s4, 4  ;;  %s1121_s26 = int_to_ptr.vmem [resolvable:$false] %s1120_s26 }
 0x1b5   : > { %v445_v53 = vld [vmem:[#allocation2 + $0x18] sm:$0xff]  ;;  %867 = vmatprep.subr.bf16.mxu0 %v866_v52  ;;  %898 = vmatprep.subr.bf16.mxu1 %v866_v52  ;;  %p1118_p1 = pnand %p1117_p9, %p1405_p10  ;;  %s1122_s29 = scalar_lea.vmem %s1121_s26, 1024 }
 0x1b6   : > { %v444_v51 = vld [vmem:[#allocation2 + $0x10] sm:$0xff]  ;;  %869 = vmatpush3.bf16.msra.mxu0 %v866_v52  ;;  %902 = vmatpush3.bf16.msra.mxu1 %v866_v52  ;;  %v449_v61 = vld [vmem:[#allocation2 + $0x38] sm:$0xff]  ;;  %s727_s2 = sshll.u32 %s1710_s18, 3  ;;  %p1123_p7 = scmp.lt.s32.totalorder %s1592_s22, %s1121_s26 }
 0x1b7   : > { %v870_v54 = vpack.c.bf16 %v445_v53, %v444_v51  ;;  %v448_v60 = vld [vmem:[#allocation2 + $0x30] sm:$0xff]  ;;  %s577_s7 = sadd.s32 %s727_s2, %s726_s8  ;;  %s1713_s5 = smov %s1712_s15 }
 0x1b8   : > { %v878_v62 = vpack.c.bf16 %v449_v61, %v448_v60  ;;  %s728_s13 = sshll.u32 %s577_s7, 7  ;;  %p1119_p12 = pneg %p1118_p1 }
 0x1b9   : > { %871 = vmatprep.subr.bf16.mxu0 %v870_v54  ;;  %899 = vmatprep.subr.bf16.mxu1 %v870_v54  ;;  %s1590_s30 = scalar_lea.hbm %s1712_s15, %s728_s13  ;;  %p1124_p3 = scmp.lt.s32.totalorder %s1122_s29, %s1116_s27 }
 0x1ba   : > { %873 = vmatpush3.bf16.msra.mxu0 %v870_v54  ;;  %903 = vmatpush3.bf16.msra.mxu1 %v870_v54 }
 0x1bb   : > { %875 = vmatprep.subr.bf16.mxu0 %v874_v59  ;;  %900 = vmatprep.subr.bf16.mxu1 %v874_v59  ;;  %p1125_p6 = por %p1124_p3, %p1123_p7 }
 0x1bd   : > { %p1126_p8 = pnand %p1125_p6, %p1119_p12 }
 0x1be   : > { %877 = vmatpush3.bf16.msra.mxu0 %v874_v59  ;;  %904 = vmatpush3.bf16.msra.mxu1 %v874_v59 }
 0x1bf   : > { %879 = vmatprep.subr.bf16.mxu0 %v878_v62  ;;  %901 = vmatprep.subr.bf16.mxu1 %v878_v62 }
 0x1c2   : > { %881 = vmatpush3.bf16.msra.mxu0 %v878_v62  ;;  %905 = vmatpush3.bf16.msra.mxu1 %v878_v62 }
 0x1c5   : > { %829 = vmatmul.mubr.msk.f32.vlgmr.msra.gmra.mrb[0].mxu0 %vm450_vm0, %v439_v63  ;;  %832 = vmatmul.mubr.msk.f32.vlgmr.msra.gmra.mrb[0].mxu1 %vm450_vm0, %v441_v0 }
 0x298   : > { %v830_v1 = vpop.f32.mrb[0].mxu0  ;;  %v833_v2 = vpop.f32.mrb[0].mxu1 }
 0x299   : > { %vm549_vm1 = vcmp.gt.f32.partialorder %v830_v1, 0.0  ;;  %v553_v3 = vmul.f32 0.01, %v830_v1  ;;  %vm551_vm2 = vcmp.gt.f32.partialorder %v833_v2, 0.0  ;;  %v555_v4 = vmul.f32 0.01, %v833_v2 }
 0x29a   : > { %v529_v5 = vpop.f32.mrb[1].mxu0  ;;  %v539_v6 = vpop.f32.mrb[1].mxu1 }
 0x29b   : > { %v557_v7 = vsel %vm549_vm1, %v830_v1, %v553_v3  ;;  %v559_v8 = vsel %vm551_vm2, %v833_v2, %v555_v4  ;;  %vm548_vm3 = vcmp.gt.f32.partialorder %v529_v5, 0.0  ;;  %v552_v9 = vmul.f32 0.01, %v529_v5 }
 0x29c   : > { %561 = vst [vmem:[%s1560_s28 + $0x8] sm:$0xff] %v557_v7  ;;  %563 = vst [vmem:[%s1560_s28 + $0x18] sm:$0xff] %v559_v8  ;;  %vm550_vm4 = vcmp.gt.f32.partialorder %v539_v6, 0.0  ;;  %v554_v10 = vmul.f32 0.01, %v539_v6 }
 0x29d   : > { %v556_v11 = vsel %vm548_vm3, %v529_v5, %v552_v9 }
 0x29e   : > { %560 = vst [vmem:[%s1560_s28] sm:$0xff] %v556_v11  ;;  %v558_v12 = vsel %vm550_vm4, %v539_v6, %v554_v10 }
 0x29f   : > { %562 = vst [vmem:[%s1560_s28 + $0x10] sm:$0xff] %v558_v12 }
 0x2a0   : > { %1129 = shalt.err (!%p1126_p8)
}
 0x2a1   : > { %s1130_s28 = scalar_lea.hbm %s1590_s30, 512  ;;  %s1134_s8 = scalar_lea.hbm %s1713_s5, 4096 }
 0x2a2   : > { %p1131_p2 = scmp.ne.s32.totalorder %s1590_s30, %s1130_s28  ;;  %p1135_p4 = scmp.lt.u32.totalorder %s1590_s30, %s1713_s5 }
 0x2a3   : > { %p1136_p13 = scmp.lt.u32.totalorder %s1134_s8, %s1130_s28  ;;  %p1138_p9 = scmp.lt.u32.totalorder %s1130_s28, %s1590_s30 }
 0x2a4   : > { %p1132_p11 = pnand %p1131_p2, %p1405_p10 }
 0x2a5   : > { %p1137_p0 = por %p1136_p13, %p1135_p4 }
 0x2a6   : > { %p1133_p5 = pneg %p1132_p11 }
 0x2a7   : > { %p1139_p1 = por %p1138_p9, %p1137_p0 }
 0x2a9   : > { %p1140_p12 = pnand %p1139_p1, %p1133_p5 }
 0x2ab   : > { %1143 = shalt.err (!%p1140_p12)
}
 0x2ac   : > { %s1254_s13 = smov 128   ;;  %s1255_s9 = smov 8  }
 0x2ad   : > { %914 = dma.vmem_to_hbm [thread:$0]  (%p1405_p10), %s1592_s22, 512, %s1590_s30, %s565_s3, %s1254_s13, %s1254_s13, %s1255_s9  }
 0x2ae PF: > { %s1714_s14 = sld [smem:[#allocation14_spill]]  ;;  %s1715_s15 = sld [smem:[#allocation16_spill]] }
 0x2af   : > { %p934_p7 = scmp.ge.s32.totalorder %s1246_s25, 2 }
 0x2b4   : > { %s595_s27 = sand.u32 1, %s1714_s14   ;;  %p1716_p3 = scmp.ne.s32.totalorder %s1715_s15, 0 }
 0x2b5   : > { %s596_s4 = scalar_lea.sflag [#allocation5], %s595_s27 }
 0x2b6   : > { %p928_p6 = pnand %p934_p7, %p1716_p3 }
 0x2b8   : > { %1201 = dma.done.wait (!%p928_p6), %s596_s4, 512  }
 0x2b9   : > { %1203 = vsyncadd (!%p928_p6), %s596_s4, 4294966784  ;;  %s23_s25 = sadd.s32 1, %s1246_s25   ;;  %s1717_s10 = sld [smem:[#allocation17_spill]] }
 0x2ba   : > { %p20_p8 = scmp.ge.s32.totalorder %s23_s25, 10   ;;  %s1718_s30 = sld [smem:[#allocation19_spill]] }
 0x2bb   : > { %s1719_s15 = smov %s1210_s16  ;;  %s1720_s16 = smov %s1214_s17 }
 0x2bc   : > { %s1721_s17 = smov %s1483_s6  ;;  %s1722_s18 = smov %s1222_s19 }
 0x2bd   : > { %s1723_s19 = smov %s1226_s20  ;;  %s1724_s20 = smov %s1428_s12 }
 0x2be   : > { %s1725_s21 = smov %s1238_s23  ;;  %s1726_s22 = smov %s1242_s24 }
 0x2bf   : > { %s1727_s23 = smov %s1717_s10  ;;  %22 = sbr.rel (!%p20_p8) target bundleno = 15 (0xf), region = 102 }
 0x2c0   : > { %s1728_s24 = smov %s1718_s30 }
 0x2c6   :  { %601 = vsyncpa [#allocation4], 1 }
 0x2c7   :  { %603 = vsyncpa [#allocation4 + $0x1], 1 }
 0x2c8   :  { %604 = vsyncpa [#allocation7], 1 }
 0x2c9   :  { %606 = vsyncpa [#allocation7 + $0x1], 1 }
 0x2ca   :  { %607 = vsyncpa [#allocation5], 1 }
 0x2cb   :  { %609 = vsyncpa [#allocation5 + $0x1], 1 }

</bundles_post_ra>
